<compile_context>
chip_gen: v5e
topology: v5e:2x2
jax: 0.10.0
libtpu: 0.0.40
codegen_flags: <defaults>
</compile_context>

<pallas_src>
import math

import jax
import jax.numpy as jnp
import numpy as np
from jax import lax
from jax.experimental import pallas as pl
from jax.experimental.pallas import tpu as pltpu


# Conservative scoped-VMEM budget used for batch-tile selection (v6e/v7x scoped
# default is 32 MiB; pass vmem_budget=16<<20 on v5e if weights become large).
_DEFAULT_VMEM_BUDGET = 32 * 1024 * 1024


def _make_kernel(TB, S_pad, S_true, D, H):
    inv_h = 1.0 / float(H)

    def kernel(x_ref, wcat_ref, bcat_ref, hexp_ref,
               wo_ref, bo_ref, ws_ref, bs_ref, out_ref, attw_ref):
        # (TB, S, D) -> (TB*S, D): fill the MXU M dimension (S padded to a
        # multiple of 8 in the wrapper so this reshape is a free relabel).
        xf = x_ref[...].reshape(TB * S_pad, D)

        # Single fused MXU pass:  wcat = [Wv^T | Wk^T @ qmat],
        # bcat = [bv | bk @ qmat].  qmat already folds Wq, bq, the 1/sqrt(dh)
        # scale and the per-head block mask, so columns D..D+H of `proj` are
        # the H per-head attention scores; K never materializes in the kernel.
        proj = jnp.dot(xf, wcat_ref[...],
                       preferred_element_type=jnp.float32) + bcat_ref[...]
        vf = proj[:, :D]                              # (TB*S, D)   projected V
        s3 = proj[:, D:].reshape(TB, S_pad, H)        # (TB, S, H)  head scores

        if S_pad != S_true:
            # Mask zero-padded key positions out of the softmax.
            pos = lax.broadcasted_iota(jnp.int32, (TB, S_pad, H), 1)
            s3 = jnp.where(pos < S_true, s3, jnp.float32(-1e30))

        # Softmax over the sequence axis, per (batch element, head).
        m = jnp.max(s3, axis=1, keepdims=True)        # (TB, 1, H)
        e = jnp.exp(s3 - m)                           # (TB, S, H)
        l = jnp.sum(e, axis=1, keepdims=True)         # (TB, 1, H)
        # One reciprocal per (batch, head) row + VPU multiply instead of a
        # per-element divide.  Exact divide keeps the 1e-5 check; use
        # pl.reciprocal(l, approx=True) if the tolerance can be relaxed.
        p = e * (1.0 / l)                             # (TB, S, H)
        # TODO(synk): attention dropout is training-only; omitted (eval mode).

        # Averaged attention weights (average_attn_weights=True in PyTorch),
        # stored as a dense (TB, S) block (no masked 1-sublane stores).
        attw_ref[...] = jnp.sum(p, axis=-1) * inv_h

        # PV contraction: expand per-head probs across each head's dh lanes
        # with one small matmul, weight V on the VPU, reduce over S.
        p_exp = jnp.dot(p.reshape(TB * S_pad, H), hexp_ref[...],
                        preferred_element_type=jnp.float32)       # (TB*S, D)
        o = jnp.sum((p_exp * vf).reshape(TB, S_pad, D), axis=1)   # (TB, D)

        # Output projection + intent gating.
        out = jnp.dot(o, wo_ref[...],
                      preferred_element_type=jnp.float32) + bo_ref[...]
        score = jax.nn.sigmoid(
            jnp.dot(out, ws_ref[...],
                    preferred_element_type=jnp.float32) + bs_ref[...])
        out_ref[...] = out * score

    return kernel


def _weight_bytes(D, H):
    """f32 bytes of all resident (constant-index) weight blocks."""
    return 4 * (D * (D + H) + (D + H)     # wcat, bcat
                + H * D                   # head-expansion matrix
                + D * D + D               # Wo^T, bo
                + D + 1)                  # Ws^T, bs


def _live_block_bytes(tb, s, D, H):
    """Approximate per-grid-step live f32 bytes excluding the weights."""
    rows = tb * s
    return 4 * (2 * tb * s * D            # x block (double-buffered)
                + rows * (D + H)          # fused projection intermediate
                + rows * D                # head-expanded probabilities
                + 2 * rows * H            # softmax intermediates
                + 2 * (tb * D + tb * s))  # out / attw blocks (double-buffered)


def _pick_block_b(B, s_pad, D, H, vmem_budget=_DEFAULT_VMEM_BUDGET):
    """VMEM-aware batch-tile size.

    TB divides B, is a multiple of 8 (or equals B), keeps per-step live bytes
    within ~85% of the VMEM budget, and -- when a fitting candidate exists --
    yields at least 2 grid steps so the 'parallel' batch axis can shard across
    v7x's two TensorCores and the x DMA pipelines against compute.
    """
    budget = int(0.85 * vmem_budget) - 2 * _weight_bytes(D, H)
    cands = [tb for tb in range(8, B, 8) if B % tb == 0] + [B]
    fitting = [tb for tb in cands if _live_block_bytes(tb, s_pad, D, H) <= budget]
    if not fitting:
        return min(cands)               # weights dominate VMEM; smallest legal tile
    multi = [tb for tb in fitting if B // tb >= 2]
    return max(multi) if multi else max(fitting)


def _const_spec(shape, single_buffer):
    zeros = (0,) * len(shape)
    if single_buffer:
        # Constant index_map => the block never changes; one VMEM buffer
        # suffices and saves a full copy of the weights (v7x / large-D lever).
        return pl.BlockSpec(shape, lambda b: zeros, pipeline_mode=pl.Buffered(1))
    return pl.BlockSpec(shape, lambda b: zeros)


def citation_intent_attention(x, params, block_b=None,
                              vmem_budget=_DEFAULT_VMEM_BUDGET,
                              single_buffer_weights=False):
    """x: (B, S, D) float32 -> (output (B, D), attn_weights (B, 1, S))."""
    B, S, D = x.shape
    H = params["nhead"]
    dh = D // H
    scale = 1.0 / math.sqrt(dh)

    # ---- Hoisted / folded operand preparation (plain JAX, once per call) ----
    # q = intent_query @ Wq^T + bq is batch-invariant; fold it (with the scale
    # and the per-head block mask) into qmat, then fold qmat straight into Wk
    # so the kernel never materializes K:  scores = x @ (Wk^T@qmat) + bk@qmat.
    q = params["intent_query"] @ params["wq"].T + params["bq"]          # (1, D)
    head_mask = (jnp.arange(D)[:, None] // dh ==
                 jnp.arange(H)[None, :]).astype(jnp.float32)            # (D, H)
    qmat = (q * scale).reshape(D, 1) * head_mask                        # (D, H)
    wscore = params["wk"].T @ qmat                                      # (D, H)
    bscore = params["bk"] @ qmat                                        # (1, H)
    wcat = jnp.concatenate([params["wv"].T, wscore], axis=1)            # (D, D+H)
    bcat = jnp.concatenate([params["bv"], bscore], axis=1)              # (1, D+H)
    hexp = head_mask.T                                                  # (H, D)
    wo_t = params["wo"].T                                               # (D, D)
    ws_t = params["ws"].T                                               # (D, 1)

    # Pad S to a multiple of 8 so in-kernel reshapes stay free relabels.
    S_pad = ((S + 7) // 8) * 8
    if S_pad != S:
        x = jnp.pad(x, ((0, 0), (0, S_pad - S), (0, 0)))

    TB = block_b if block_b is not None else _pick_block_b(
        B, S_pad, D, H, vmem_budget)
    assert B % TB == 0, "block_b must divide the batch size"

    # Explicit VMEM limit: do not rely on the per-generation scoped default
    # (16 MiB on v5e / 32 MiB on v6e,v7x).
    vmem_need = (2 * _weight_bytes(D, H)
                 + _live_block_bytes(TB, S_pad, D, H) + (4 << 20))
    vmem_limit = int(min(100 << 20, max(32 << 20, vmem_need)))

    flops = int(2 * B * S_pad * D * (D + H)     # fused V + score projection
                + 2 * B * S_pad * H * D         # head-expansion matmul
                + 2 * B * S_pad * D             # weighted V + reduce over S
                + 2 * B * D * D                 # output projection
                + 2 * B * D)                    # intent score
    transcendentals = int(B * S_pad * H + B)
    bytes_accessed = int(4 * B * S_pad * D + _weight_bytes(D, H)
                         + 4 * (B * D + B * S_pad))

    out, attw = pl.pallas_call(
        _make_kernel(TB, S_pad, S, D, H),
        out_shape=(
            jax.ShapeDtypeStruct((B, D), jnp.float32),
            jax.ShapeDtypeStruct((B, S_pad), jnp.float32),
        ),
        grid_spec=pltpu.PrefetchScalarGridSpec(
            num_scalar_prefetch=0,
            grid=(B // TB,),
            in_specs=[
                pl.BlockSpec((TB, S_pad, D), lambda b: (b, 0, 0)),    # x
                _const_spec((D, D + H), single_buffer_weights),       # [Wv^T | Wk^T@qmat]
                _const_spec((1, D + H), single_buffer_weights),       # [bv | bk@qmat]
                _const_spec((H, D), single_buffer_weights),           # head expand
                _const_spec((D, D), single_buffer_weights),           # Wo^T
                _const_spec((1, D), single_buffer_weights),           # bo
                _const_spec((D, 1), single_buffer_weights),           # Ws^T
                _const_spec((1, 1), single_buffer_weights),           # bs
            ],
            out_specs=[
                pl.BlockSpec((TB, D), lambda b: (b, 0)),
                pl.BlockSpec((TB, S_pad), lambda b: (b, 0)),
            ],
        ),
        compiler_params=pltpu.CompilerParams(
            dimension_semantics=("parallel",),
            vmem_limit_bytes=vmem_limit),
        cost_estimate=pl.CostEstimate(
            flops=flops, transcendentals=transcendentals,
            bytes_accessed=bytes_accessed),
    )(x, wcat, bcat, hexp, wo_t, params["bo"], ws_t, params["bs"])

    return out, attw[:, :S].reshape(B, 1, S)


def reference(x, params):
    """Pure-JAX reference mirroring torch.nn.MultiheadAttention (eval mode)."""
    B, S, D = x.shape
    H = params["nhead"]
    dh = D // H
    iq = jnp.broadcast_to(params["intent_query"], (B, 1, D))
    q = iq @ params["wq"].T + params["bq"]
    k = x @ params["wk"].T + params["bk"]
    v = x @ params["wv"].T + params["bv"]
    qh = q.reshape(B, 1, H, dh).transpose(0, 2, 1, 3)
    kh = k.reshape(B, S, H, dh).transpose(0, 2, 1, 3)
    vh = v.reshape(B, S, H, dh).transpose(0, 2, 1, 3)
    s = jnp.einsum("bhqd,bhkd->bhqk", qh, kh) / math.sqrt(dh)
    p = jax.nn.softmax(s, axis=-1)
    o = jnp.einsum("bhqk,bhkd->bhqd", p, vh)
    o = o.transpose(0, 2, 1, 3).reshape(B, 1, D)
    out = o @ params["wo"].T + params["bo"]
    attw = p.mean(axis=1)                                  # (B, 1, S)
    score = jax.nn.sigmoid(out @ params["ws"].T + params["bs"])
    return (out * score).reshape(B, D), attw


def init_params(key, d_model, nhead):
    ks = jax.random.split(key, 8)
    sc = 1.0 / math.sqrt(d_model)
    return {
        "nhead": nhead,
        "intent_query": jax.random.normal(ks[0], (1, d_model), jnp.float32),
        "wq": jax.random.normal(ks[1], (d_model, d_model), jnp.float32) * sc,
        "wk": jax.random.normal(ks[2], (d_model, d_model), jnp.float32) * sc,
        "wv": jax.random.normal(ks[3], (d_model, d_model), jnp.float32) * sc,
        "bq": jnp.zeros((1, d_model), jnp.float32),
        "bk": jnp.zeros((1, d_model), jnp.float32),
        "bv": jnp.zeros((1, d_model), jnp.float32),
        "wo": jax.random.normal(ks[4], (d_model, d_model), jnp.float32) * sc,
        "bo": jax.random.normal(ks[5], (1, d_model), jnp.float32) * 0.01,
        "ws": jax.random.normal(ks[6], (1, d_model), jnp.float32) * sc,
        "bs": jax.random.normal(ks[7], (1, 1), jnp.float32) * 0.01,
    }


if __name__ == "__main__":
    B, S, D, H = 2, 8, 32, 4
    key = jax.random.PRNGKey(0)
    pkey, xkey = jax.random.split(key)
    params = init_params(pkey, D, H)
    x = jax.random.normal(xkey, (B, S, D), jnp.float32)

    out, attw = citation_intent_attention(x, params)
    out = jax.block_until_ready(out)
    attw = jax.block_until_ready(attw)

    ref_out, ref_attw = reference(x, params)
    assert out.shape == (B, D) and attw.shape == (B, 1, S)
    assert np.allclose(np.asarray(out), np.asarray(ref_out), atol=1e-5, rtol=1e-5)
    assert np.allclose(np.asarray(attw), np.asarray(ref_attw), atol=1e-5, rtol=1e-5)

    print("KERNEL_OK")
</pallas_src>

<mosaic_0001>
module attributes {stable_mosaic.version = 11 : i64} {
  func.func @kernel(%arg0: i32, %arg1: memref<2x8x32xf32, #tpu.memory_space<vmem>>, %arg2: memref<32x36xf32, #tpu.memory_space<vmem>>, %arg3: memref<1x36xf32, #tpu.memory_space<vmem>>, %arg4: memref<4x32xf32, #tpu.memory_space<vmem>>, %arg5: memref<32x32xf32, #tpu.memory_space<vmem>>, %arg6: memref<1x32xf32, #tpu.memory_space<vmem>>, %arg7: memref<32x1xf32, #tpu.memory_space<vmem>>, %arg8: memref<1x1xf32, #tpu.memory_space<vmem>>, %arg9: memref<2x32xf32, #tpu.memory_space<vmem>>, %arg10: memref<2x8xf32, #tpu.memory_space<vmem>>) attributes {dimension_semantics = [#tpu.dimension_semantics<parallel>], iteration_bounds = array<i64: 1>, scalar_prefetch = 0 : i64, scratch_operands = 0 : i64, tpu.core_type = #tpu.core_type<tc>, window_params = [{transform_indices = @transform_0, window_bounds = array<i64: 2, 8, 32>}, {pipeline_mode = #tpu.pipeline_mode<synchronous>, transform_indices = @transform_1, window_bounds = array<i64: 32, 36>}, {pipeline_mode = #tpu.pipeline_mode<synchronous>, transform_indices = @transform_2, window_bounds = array<i64: 1, 36>}, {pipeline_mode = #tpu.pipeline_mode<synchronous>, transform_indices = @transform_3, window_bounds = array<i64: 4, 32>}, {pipeline_mode = #tpu.pipeline_mode<synchronous>, transform_indices = @transform_4, window_bounds = array<i64: 32, 32>}, {pipeline_mode = #tpu.pipeline_mode<synchronous>, transform_indices = @transform_5, window_bounds = array<i64: 1, 32>}, {pipeline_mode = #tpu.pipeline_mode<synchronous>, transform_indices = @transform_6, window_bounds = array<i64: 32, 1>}, {pipeline_mode = #tpu.pipeline_mode<synchronous>, transform_indices = @transform_7, window_bounds = array<i64: 1, 1>}, {transform_indices = @transform_8, window_bounds = array<i64: 2, 32>}, {transform_indices = @transform_9, window_bounds = array<i64: 2, 8>}]} {
    %c0 = arith.constant 0 : index
    %c0_0 = arith.constant 0 : index
    %c0_1 = arith.constant 0 : index
    %0 = vector.load %arg1[%c0, %c0_0, %c0_1] : memref<2x8x32xf32, #tpu.memory_space<vmem>>, vector<2x8x32xf32>
    %1 = vector.shape_cast %0 : vector<2x8x32xf32> to vector<16x32xf32>
    %c0_2 = arith.constant 0 : index
    %c0_3 = arith.constant 0 : index
    %2 = vector.load %arg2[%c0_2, %c0_3] : memref<32x36xf32, #tpu.memory_space<vmem>>, vector<32x36xf32>
    %cst = arith.constant dense<0.000000e+00> : vector<16x36xf32>
    %3 = tpu.matmul %1, %2, %cst {dimension_numbers = #tpu.dot_dimension_numbers<[1], [0], [0], [1], [0, 0, 1, 1], [], []>} : vector<16x32xf32>, vector<32x36xf32>, vector<16x36xf32> -> vector<16x36xf32>
    %c0_4 = arith.constant 0 : index
    %c0_5 = arith.constant 0 : index
    %4 = vector.load %arg3[%c0_4, %c0_5] : memref<1x36xf32, #tpu.memory_space<vmem>>, vector<1x36xf32>
    %5 = vector.broadcast %4 : vector<1x36xf32> to vector<16x36xf32>
    %6 = arith.addf %3, %5 : vector<16x36xf32>
    %7 = vector.extract_strided_slice %6 {offsets = [0, 0], sizes = [16, 32], strides = [1, 1]} : vector<16x36xf32> to vector<16x32xf32>
    %8 = vector.extract_strided_slice %6 {offsets = [0, 32], sizes = [16, 4], strides = [1, 1]} : vector<16x36xf32> to vector<16x4xf32>
    %9 = vector.shape_cast %8 : vector<16x4xf32> to vector<2x8x4xf32>
    %cst_6 = arith.constant dense<0xFF800000> : vector<2x4xf32>
    %10 = vector.multi_reduction <maximumf>, %9, %cst_6 [1] : vector<2x8x4xf32> to vector<2x4xf32>
    %11 = vector.shape_cast %10 : vector<2x4xf32> to vector<2x1x4xf32>
    %12 = vector.broadcast %11 : vector<2x1x4xf32> to vector<2x8x4xf32>
    %13 = arith.subf %9, %12 : vector<2x8x4xf32>
    %14 = math.exp %13 : vector<2x8x4xf32>
    %cst_7 = arith.constant dense<0.000000e+00> : vector<2x4xf32>
    %15 = vector.multi_reduction <add>, %14, %cst_7 [1] : vector<2x8x4xf32> to vector<2x4xf32>
    %16 = vector.shape_cast %15 : vector<2x4xf32> to vector<2x1x4xf32>
    %cst_8 = arith.constant 1.000000e+00 : f32
    %17 = vector.broadcast %cst_8 : f32 to vector<2x1x4xf32>
    %18 = arith.divf %17, %16 : vector<2x1x4xf32>
    %19 = vector.broadcast %18 : vector<2x1x4xf32> to vector<2x8x4xf32>
    %20 = arith.mulf %14, %19 : vector<2x8x4xf32>
    %cst_9 = arith.constant dense<0.000000e+00> : vector<2x8xf32>
    %21 = vector.multi_reduction <add>, %20, %cst_9 [2] : vector<2x8x4xf32> to vector<2x8xf32>
    %cst_10 = arith.constant 2.500000e-01 : f32
    %22 = vector.broadcast %cst_10 : f32 to vector<2x8xf32>
    %23 = arith.mulf %21, %22 : vector<2x8xf32>
    %c0_11 = arith.constant 0 : index
    %c0_12 = arith.constant 0 : index
    %24 = vector.load %arg10[%c0_11, %c0_12] : memref<2x8xf32, #tpu.memory_space<vmem>>, vector<2x8xf32>
    tpu.vector_store %arg10[%c0_11, %c0_12], %23 {strides = array<i32>} : memref<2x8xf32, #tpu.memory_space<vmem>>, vector<2x8xf32>,
    %25 = vector.shape_cast %20 : vector<2x8x4xf32> to vector<16x4xf32>
    %c0_13 = arith.constant 0 : index
    %c0_14 = arith.constant 0 : index
    %26 = vector.load %arg4[%c0_13, %c0_14] : memref<4x32xf32, #tpu.memory_space<vmem>>, vector<4x32xf32>
    %cst_15 = arith.constant dense<0.000000e+00> : vector<16x32xf32>
    %27 = tpu.matmul %25, %26, %cst_15 {dimension_numbers = #tpu.dot_dimension_numbers<[1], [0], [0], [1], [0, 0, 1, 1], [], []>} : vector<16x4xf32>, vector<4x32xf32>, vector<16x32xf32> -> vector<16x32xf32>
    %28 = arith.mulf %27, %7 : vector<16x32xf32>
    %29 = vector.shape_cast %28 : vector<16x32xf32> to vector<2x8x32xf32>
    %cst_16 = arith.constant dense<0.000000e+00> : vector<2x32xf32>
    %30 = vector.multi_reduction <add>, %29, %cst_16 [1] : vector<2x8x32xf32> to vector<2x32xf32>
    %c0_17 = arith.constant 0 : index
    %c0_18 = arith.constant 0 : index
    %31 = vector.load %arg5[%c0_17, %c0_18] : memref<32x32xf32, #tpu.memory_space<vmem>>, vector<32x32xf32>
    %cst_19 = arith.constant dense<0.000000e+00> : vector<2x32xf32>
    %32 = tpu.matmul %30, %31, %cst_19 {dimension_numbers = #tpu.dot_dimension_numbers<[1], [0], [0], [1], [0, 0, 1, 1], [], []>} : vector<2x32xf32>, vector<32x32xf32>, vector<2x32xf32> -> vector<2x32xf32>
    %c0_20 = arith.constant 0 : index
    %c0_21 = arith.constant 0 : index
    %33 = vector.load %arg6[%c0_20, %c0_21] : memref<1x32xf32, #tpu.memory_space<vmem>>, vector<1x32xf32>
    %34 = vector.broadcast %33 : vector<1x32xf32> to vector<2x32xf32>
    %35 = arith.addf %32, %34 : vector<2x32xf32>
    %c0_22 = arith.constant 0 : index
    %c0_23 = arith.constant 0 : index
    %36 = vector.load %arg7[%c0_22, %c0_23] : memref<32x1xf32, #tpu.memory_space<vmem>>, vector<32x1xf32>
    %cst_24 = arith.constant dense<0.000000e+00> : vector<2x1xf32>
    %37 = tpu.matmul %35, %36, %cst_24 {dimension_numbers = #tpu.dot_dimension_numbers<[1], [0], [0], [1], [0, 0, 1, 1], [], []>} : vector<2x32xf32>, vector<32x1xf32>, vector<2x1xf32> -> vector<2x1xf32>
    %c0_25 = arith.constant 0 : index
    %c0_26 = arith.constant 0 : index
    %38 = vector.load %arg8[%c0_25, %c0_26] : memref<1x1xf32, #tpu.memory_space<vmem>>, vector<1x1xf32>
    %39 = vector.broadcast %38 : vector<1x1xf32> to vector<2x1xf32>
    %40 = arith.addf %37, %39 : vector<2x1xf32>
    %41 = arith.negf %40 : vector<2x1xf32>
    %42 = math.exp %41 : vector<2x1xf32>
    %cst_27 = arith.constant 1.000000e+00 : f32
    %43 = vector.broadcast %cst_27 : f32 to vector<2x1xf32>
    %44 = arith.addf %43, %42 : vector<2x1xf32>
    %45 = arith.divf %43, %44 : vector<2x1xf32>
    %46 = vector.broadcast %45 : vector<2x1xf32> to vector<2x32xf32>
    %47 = arith.mulf %35, %46 : vector<2x32xf32>
    %c0_28 = arith.constant 0 : index
    %c0_29 = arith.constant 0 : index
    %48 = vector.load %arg9[%c0_28, %c0_29] : memref<2x32xf32, #tpu.memory_space<vmem>>, vector<2x32xf32>
    tpu.vector_store %arg9[%c0_28, %c0_29], %47 {strides = array<i32>} : memref<2x32xf32, #tpu.memory_space<vmem>>, vector<2x32xf32>,
    return
  }
  func.func @transform_0(%arg0: i32) -> (i32, i32, i32) {
    %c0_i32 = arith.constant 0 : i32
    %c0_i32_0 = arith.constant 0 : i32
    %c0_i32_1 = arith.constant 0 : i32
    return %arg0, %c0_i32, %c0_i32_0 : i32, i32, i32
  }
  func.func @transform_1(%arg0: i32) -> (i32, i32) {
    %c0_i32 = arith.constant 0 : i32
    %c0_i32_0 = arith.constant 0 : i32
    %c0_i32_1 = arith.constant 0 : i32
    return %c0_i32, %c0_i32_0 : i32, i32
  }
  func.func @transform_2(%arg0: i32) -> (i32, i32) {
    %c0_i32 = arith.constant 0 : i32
    %c0_i32_0 = arith.constant 0 : i32
    %c0_i32_1 = arith.constant 0 : i32
    return %c0_i32, %c0_i32_0 : i32, i32
  }
  func.func @transform_3(%arg0: i32) -> (i32, i32) {
    %c0_i32 = arith.constant 0 : i32
    %c0_i32_0 = arith.constant 0 : i32
    %c0_i32_1 = arith.constant 0 : i32
    return %c0_i32, %c0_i32_0 : i32, i32
  }
  func.func @transform_4(%arg0: i32) -> (i32, i32) {
    %c0_i32 = arith.constant 0 : i32
    %c0_i32_0 = arith.constant 0 : i32
    %c0_i32_1 = arith.constant 0 : i32
    return %c0_i32, %c0_i32_0 : i32, i32
  }
  func.func @transform_5(%arg0: i32) -> (i32, i32) {
    %c0_i32 = arith.constant 0 : i32
    %c0_i32_0 = arith.constant 0 : i32
    %c0_i32_1 = arith.constant 0 : i32
    return %c0_i32, %c0_i32_0 : i32, i32
  }
  func.func @transform_6(%arg0: i32) -> (i32, i32) {
    %c0_i32 = arith.constant 0 : i32
    %c0_i32_0 = arith.constant 0 : i32
    %c0_i32_1 = arith.constant 0 : i32
    return %c0_i32, %c0_i32_0 : i32, i32
  }
  func.func @transform_7(%arg0: i32) -> (i32, i32) {
    %c0_i32 = arith.constant 0 : i32
    %c0_i32_0 = arith.constant 0 : i32
    %c0_i32_1 = arith.constant 0 : i32
    return %c0_i32, %c0_i32_0 : i32, i32
  }
  func.func @transform_8(%arg0: i32) -> (i32, i32) {
    %c0_i32 = arith.constant 0 : i32
    %c0_i32_0 = arith.constant 0 : i32
    return %arg0, %c0_i32 : i32, i32
  }
  func.func @transform_9(%arg0: i32) -> (i32, i32) {
    %c0_i32 = arith.constant 0 : i32
    %c0_i32_0 = arith.constant 0 : i32
    return %arg0, %c0_i32 : i32, i32
  }
}

</mosaic_0001>

<bundles_post_ra>
// kernel: tpu_custom_call.1
= control target key start
LH: loop header
LB: loop body
LE: loop exit
PB: predicated region body
PF: predicated region fallthrough
CT: control target
= control target key end

     0   :  { %s679_s0 = inlined_call_operand.hbm [shape: f32[2,8,32], index: 0, kind: input, shape index: {}]   ;;  %s680_s1 = inlined_call_operand.vmem [shape: f32[32,36], index: 1, kind: input, shape index: {}]   ;;  %s681_s2 = inlined_call_operand.hbm [shape: f32[1,36], index: 2, kind: input, shape index: {}]   ;;  %s682_s3 = inlined_call_operand.vmem [shape: f32[4,32], index: 3, kind: input, shape index: {}]   ;;  %s683_s4 = inlined_call_operand.hbm [shape: f32[32,32], index: 4, kind: input, shape index: {}]   ;;  %s684_s5 = inlined_call_operand.vmem [shape: f32[1,32], index: 5, kind: input, shape index: {}]   ;;  %s685_s6 = inlined_call_operand.vmem [shape: f32[32,1], index: 6, kind: input, shape index: {}]   ;;  %s686_s7 = inlined_call_operand.<no memory space> [shape: f32[1,1], index: 7, kind: input, shape index: {}]   ;;  %s687_s8 = inlined_call_operand.hbm [shape: f32[2,32], index: 8, kind: output, shape index: {0}]   ;;  %s688_s9 = inlined_call_operand.hbm [shape: f32[2,8], index: 9, kind: output, shape index: {1}]  }
   0x1   :  { %v15_v0 = vstv %s686_s7 }
   0x2   :  { %16 = vst [vmem:[#allocation2] sm:$0x1] %v15_v0 }
   0x3   :  { %17 = vsyncpa [#allocation4], 0 }
   0x4   :  { %18 = vsyncpa [#allocation7], 0 }
   0x5   :  { %19 = vsyncpa [#allocation5], 0  ;;  %s41_s13 = sshll.u32 %s681_s2, 4  ;;  %s42_s13 = int_to_ptr.hbm [resolvable:$true] %s41_s13 }
   0x6   :  { %20 = vsyncpa [#allocation11], 0  ;;  %s550_s14 = smov [#allocation6]   ;;  %s25_s18 = sshll.u32 %s679_s0, 4  ;;  %s26_s18 = int_to_ptr.hbm [resolvable:$true] %s25_s18 }
   0x7   :  { %s43_s15 = sshll.u32 %s550_s14, 4  ;;  %s551_s7 = smov [#allocation3]   ;;  %s44_s15 = int_to_ptr.vmem [resolvable:$true] %s43_s15 }
   0x8   :  { %46 = dma.hbm_to_vmem [thread:$0]  %s42_s13, 16, %s44_s15, [#allocation7]  }
   0x9   :  { %s27_s19 = sshll.u32 %s551_s7, 4  ;;  %s552_s20 = smov 128   ;;  %s28_s19 = int_to_ptr.vmem [resolvable:$true] %s27_s19 }
   0xa   :  { %s553_s21 = smov 8   ;;  %s53_s2 = sshll.u32 %s683_s4, 4  ;;  %s54_s2 = int_to_ptr.hbm [resolvable:$true] %s53_s2 }
   0xb   :  { %33 = dma.hbm_to_vmem [thread:$0]  %s26_s18, 256, %s28_s19, [#allocation4], %s552_s20, %s552_s20, %s553_s21  }
   0xc   :  { %s554_s24 = smov [#allocation8]  }
   0xd   :  { %s55_s25 = sshll.u32 %s554_s24, 4  ;;  %s56_s25 = int_to_ptr.vmem [resolvable:$true] %s55_s25 }
   0xe   :  { %61 = dma.hbm_to_vmem [thread:$0]  %s54_s2, 512, %s56_s25, [#allocation7], %s552_s20, %s552_s20, %s553_s21  }
   0xf   :  { %542 = dma.done.wait [#allocation4], 256  }
  0x10   :  { %543 = vsyncadd [#allocation4], 4294967040 }
  0x11   :  { %544 = dma.done.wait [#allocation7], 528  }
  0x12   :  { %545 = vsyncadd [#allocation7], 4294966768  ;;  %v85_v1 = vld [vmem:[%s680_s1 + $0x18] sm:$0xff]  ;;  %v84_v2 = vld [vmem:[%s680_s1 + $0x10] sm:$0xff]  ;;  %vm90_vm0 = vcmask 261120   ;;  %vm120_vm1 = vcmask 294144  }
  0x13   :  { %109 = vmatpush.msra.mxu0 %v85_v1  ;;  %v83_v3 = vld [vmem:[%s680_s1 + $0x8] sm:$0xff]  ;;  %v82_v4 = vld [vmem:[%s680_s1] sm:$0xff]  ;;  %v407_v7 = vld [vmem:[#allocation6] ss:$0 sm:$0xff]  ;;  %vm220_vm2 = vcmask 1043456   ;;  %vm195_vm11 = vcmask 31744  }
  0x14   :  { %v80_v5 = vld [vmem:[#allocation3] sm:$0xff]  ;;  %v81_v6 = vld [vmem:[#allocation3 + $0x8] sm:$0xff]  ;;  %vm210_vm12 = vcmask 1041409   ;;  %vm213_vm13 = vcmask 58368   ;;  %s557_s21 = smov [#allocation10]   ;;  %s372_s24 = sshll.u32 %s688_s9, 4  ;;  %s373_s24 = int_to_ptr.hbm [resolvable:$true] %s372_s24 }
  0x15   :  { %110 = vmatpush.msra.mxu0 %v84_v2  ;;  %v215_v38 = vld [vmem:[%s682_s3] sm:$0xf]  ;;  %s555_s3 = smov 96   ;;  %s370_s22 = sshll.u32 %s557_s21, 4  ;;  %s371_s22 = int_to_ptr.vmem [resolvable:$true] %s370_s22 }
  0x16   :  { %390 = vmatpush.msk.msra.mxu1 %vm220_vm2, %v215_v38  ;;  %s361_s0 = sshll.u32 %s687_s8, 4  ;;  %vm352_vm2 = vcmask 254976   ;;  %s362_s0 = int_to_ptr.hbm [resolvable:$true] %s361_s0 }
  0x17   :  { %111 = vmatpush.msra.mxu0 %v83_v3 }
  0x19   :  { %112 = vmatpush.msra.mxu0 %v82_v4 }
  0x1a   :  { %388 = vmatmul.msk.f32.vlgmr.msra.gmra.mxu0 %vm90_vm0, %v80_v5 }
  0x22   :  { %389 = vmatmul.msk.f32.gmra.mxu0 %vm90_vm0, %v81_v6 }
  0x97   :  { %v114_v8 = vpop.f32.mrf.mxu0 }
  0x98   :  { %v635_v9 = vadd.f32 %v407_v7, %v114_v8 }
  0x9a   :  { %v121_v10 = vsel %vm120_vm1, %v635_v9, -inf }
  0x9b   :  { %v122_v11 = vrot.slane %v121_v10, 4 }
  0x9d   :  { %v123_v12 = vmax.f32 %v121_v10, %v122_v11  ;;  %v266_v10 = vld [vmem:[#allocation8 + $0x18] sm:$0xff]  ;;  %v265_v11 = vld [vmem:[#allocation8 + $0x10] sm:$0xff] }
  0x9e   :  { %288 = vmatpush.msra.mxu2 %v266_v10 }
  0x9f   :  { %v124_v13 = vrot.slane %v123_v12, 2  ;;  %v117_v14 = vpop.f32.mrf.mxu0 }
  0xa0   :  { %v639_v15 = vadd.f32 %v407_v7, %v117_v14  ;;  %289 = vmatpush.msra.mxu2 %v265_v11 }
  0xa1   :  { %v125_v16 = vmax.f32 %v123_v12, %v124_v13  ;;  %v264_v12 = vld [vmem:[#allocation8 + $0x8] sm:$0xff]  ;;  %v263_v13 = vld [vmem:[#allocation8] sm:$0xff] }
  0xa2   :  { %v128_v17 = vsel %vm120_vm1, %v639_v15, -inf  ;;  %290 = vmatpush.msra.mxu2 %v264_v12 }
  0xa3   :  { %v126_v18 = vrot.slane %v125_v16, 1  ;;  %v129_v19 = vrot.slane %v128_v17, 4 }
  0xa4   :  { %291 = vmatpush.msra.mxu2 %v263_v13 }
  0xa5   :  { %v127_v20 = vmax.f32 %v125_v16, %v126_v18  ;;  %v130_v21 = vmax.f32 %v128_v17, %v129_v19  ;;  %v299_v16 = vld [vmem:[%s685_s6 + $0x18] sm:$0xff]  ;;  %v298_v17 = vld [vmem:[%s685_s6 + $0x10] sm:$0xff]  ;;  %v206_v18 = vlaneseq }
  0xa6   :  { %319 = vmatpush.msra.mxu3 %v299_v16 }
  0xa7   :  { %v135_v22 = vsub.f32 %v635_v9, %v127_v20  ;;  %v131_v23 = vrot.slane %v130_v21, 2  ;;  %v207_v19 = vand.u32 127, %v206_v18 }
  0xa8   :  { %320 = vmatpush.msra.mxu3 %v298_v17 }
  0xa9   :  { %v137_v24 = vmul.f32 1.442695, %v135_v22  ;;  %v132_v25 = vmax.f32 %v130_v21, %v131_v23 }
  0xab   :  { %410 = vpow2.f32 %v137_v24  ;;  %v133_v26 = vrot.slane %v132_v25, 1 }
  0xad   :  { %v134_v27 = vmax.f32 %v132_v25, %v133_v26 }
  0xaf   :  { %v136_v28 = vsub.f32 %v639_v15, %v134_v27 }
  0xb1   :  { %v411_v29 = vpop.eup %410  ;;  %v139_v30 = vmul.f32 1.442695, %v136_v28 }
  0xb2   :  { %v141_v31 = vsel %vm120_vm1, %v411_v29, 0.0 }
  0xb3   :  { %v142_v32 = vrot.slane %v141_v31, 4  ;;  %412 = vpow2.f32 %v139_v30 }
  0xb5   :  { %v143_v33 = vadd.f32 %v142_v32, %v141_v31 }
  0xb7   :  { %v144_v34 = vrot.slane %v143_v33, 2 }
  0xb9   :  { %v413_v35 = vpop.eup %412  ;;  %v145_v36 = vadd.f32 %v144_v34, %v143_v33 }
  0xba   :  { %v148_v37 = vsel %vm120_vm1, %v413_v35, 0.0 }
  0xbb   :  { %v146_v39 = vrot.slane %v145_v36, 1  ;;  %v149_v40 = vrot.slane %v148_v37, 4 }
  0xbd   :  { %v150_v41 = vadd.f32 %v149_v40, %v148_v37  ;;  %v147_v42 = vadd.f32 %v146_v39, %v145_v36 }
  0xbf   :  { %v151_v43 = vrot.slane %v150_v41, 2  ;;  %414 = vrcp.f32 %v147_v42  ;;  %v166_v50 = vand.u32 2147483648, %v147_v42  ;;  %v164_v52 = vand.u32 2147483647, %v147_v42 }
  0xc0   :  { %vm160_vm4 = vweird.f32 %v147_v42 }
  0xc1   :  { %v152_v44 = vadd.f32 %v151_v43, %v150_v41  ;;  %v167_v55 = vor.u32 1.1754944e-38, %v166_v50  ;;  %vm165_vm6 = vcmp.eq.f32.partialorder %v164_v52, 8.507059e+37 }
  0xc3   :  { %v153_v45 = vrot.slane %v152_v44, 1 }
  0xc5   :  { %v415_v46 = vpop.eup %414  ;;  %v154_v47 = vadd.f32 %v153_v45, %v152_v44  ;;  %v296_v44 = vld [vmem:[%s685_s6] sm:$0xff] }
  0xc6   :  { %v156_v48 = vmul.f32 %v415_v46, %v147_v42  ;;  %vm161_vm3 = vweird.f32 %v415_v46  ;;  %v408_v45 = vld [vmem:[%s684_s5] ss:$0 sm:$0xff]  ;;  %s558_s5 = smov [#allocation9]  }
  0xc7   :  { %416 = vrcp.f32 %v154_v47  ;;  %vm162_vm5 = vmor %vm160_vm4, %vm161_vm3  ;;  %v181_v61 = vand.u32 2147483648, %v154_v47  ;;  %v179_v63 = vand.u32 2147483647, %v154_v47  ;;  %vm175_vm8 = vweird.f32 %v154_v47 }
  0xc8   :  { %v157_v49 = vsub.f32 1.0, %v156_v48  ;;  %v556_v48 = vmov 0  }
  0xc9   :  { %v182_v1 = vor.u32 1.1754944e-38, %v181_v61  ;;  %vm180_vm10 = vcmp.eq.f32.partialorder %v179_v63, 8.507059e+37  ;;  %405 = vset.pattern.permute.xlu2 %v556_v48  ;;  %406 = vset.pattern.permute.xlu0 %v556_v48 }
  0xca   :  { %v158_v51 = vmul.f32 %v415_v46, %v157_v49  ;;  %v409_v49 = vld [vmem:[#allocation2] ss:$0 sm:$0xff] }
  0xcc   :  { %v159_v53 = vadd.f32 %v415_v46, %v158_v51 }
  0xcd   :  { %v417_v54 = vpop.eup %416 }
  0xce   :  { %v163_v56 = vsel %vm162_vm5, %v415_v46, %v159_v53  ;;  %v171_v57 = vmul.f32 %v417_v54, %v154_v47  ;;  %vm176_vm7 = vweird.f32 %v417_v54 }
  0xcf   :  { %v168_v58 = vsel %vm165_vm6, %v167_v55, %v163_v56  ;;  %vm177_vm9 = vmor %vm175_vm8, %vm176_vm7 }
  0xd0   :  { %v185_v59 = vmul.f32 %v411_v29, %v168_v58  ;;  %v172_v60 = vsub.f32 1.0, %v171_v57 }
  0xd2   :  { %189 = vrot.lane.b32.xlu0 %v185_v59, %s555_s3  ;;  %v173_v62 = vmul.f32 %v417_v54, %v172_v60 }
  0xd4   :  { %v174_v0 = vadd.f32 %v417_v54, %v173_v62 }
  0xd6   :  { %v178_v2 = vsel %vm177_vm9, %v417_v54, %v174_v0 }
  0xd7   :  { %v183_v3 = vsel %vm180_vm10, %v182_v1, %v178_v2 }
  0xd8   :  { %v186_v4 = vmul.f32 %v413_v35, %v183_v3 }
  0xda   :  { %191 = vrot.lane.b32.xlu0 %v186_v4, %s555_s3 }
 0x144   :  { %v190_v5 = vpop.permute.xlu0 %189 }
 0x145   :  { %391 = vmatmul.msk.f32.vlgmr.msra.gmra.mxu1 %vm195_vm11, %v190_v5  ;;  %v196_v6 = vsel %vm195_vm11, %v190_v5, 0.0 }
 0x146   :  { %197 = vadd.xlane.f32.xlu1 %v196_v6 }
 0x14c   :  { %v192_v7 = vpop.permute.xlu0 %191 }
 0x14d   :  { %392 = vmatmul.msk.f32.gmra.mxu1 %vm195_vm11, %v192_v7  ;;  %v199_v8 = vsel %vm195_vm11, %v192_v7, 0.0 }
 0x14e   :  { %200 = vadd.xlane.f32.xlu1 %v199_v8 }
 0x1b9   :  { %v198_v14 = vpop.xlane.xlu1 %197 }
 0x1ba   :  { %v202_v20 = vmul.f32 0.25, %v198_v14 }
 0x1bc   :  { %v208_v25 = vperm.slane %v202_v20, %v207_v19 }
 0x1c1   :  { %v201_v21 = vpop.xlane.xlu1 %200 }
 0x1c2   :  { %v203_v22 = vmul.f32 0.25, %v201_v21  ;;  %v241_v23 = vpop.f32.mrf.mxu1 }
 0x1c3   :  { %v247_v24 = vmul.f32 %v241_v23, %v635_v9 }
 0x1c4   :  { %v209_v26 = vperm.slane %v203_v22, %v207_v19 }
 0x1c5   :  { %v249_v27 = vsel %vm90_vm0, %v247_v24, 0.0 }
 0x1c6   :  { %v250_v28 = vrot.slane %v249_v27, 4  ;;  %v211_v29 = vsel %vm210_vm12, %v209_v26, %v208_v25 }
 0x1c7   :  { %214 = vst.msk [vmem:[#allocation10] sm:$0x3] %vm213_vm13, %v211_v29 }
 0x1c8   :  { %v251_v30 = vadd.f32 %v250_v28, %v249_v27  ;;  %375 = dma.vmem_to_hbm [thread:$0]  %s371_s22, 32, %s373_s24, [#allocation11]  }
 0x1ca   :  { %v244_v31 = vpop.f32.mrf.mxu1  ;;  %v252_v33 = vrot.slane %v251_v30, 2 }
 0x1cb   :  { %v248_v32 = vmul.f32 %v244_v31, %v639_v15  ;;  %v297_v15 = vld [vmem:[%s685_s6 + $0x8] sm:$0xff]  ;;  %s359_s6 = sshll.u32 %s558_s5, 4  ;;  %s360_s6 = int_to_ptr.vmem [resolvable:$true] %s359_s6 }
 0x1cc   :  { %v253_v36 = vadd.f32 %v252_v33, %v251_v30  ;;  %321 = vmatpush.msra.mxu3 %v297_v15 }
 0x1cd   :  { %v256_v34 = vsel %vm90_vm0, %v248_v32, 0.0 }
 0x1ce   :  { %v257_v35 = vrot.slane %v256_v34, 4  ;;  %v254_v38 = vrot.slane %v253_v36, 1  ;;  %322 = vmatpush.msra.mxu3 %v296_v44 }
 0x1d0   :  { %v258_v9 = vadd.f32 %v257_v35, %v256_v34  ;;  %v255_v41 = vadd.f32 %v254_v38, %v253_v36 }
 0x1d2   :  { %v259_v37 = vrot.slane %v258_v9, 2 }
 0x1d4   :  { %v260_v39 = vadd.f32 %v259_v37, %v258_v9 }
 0x1d6   :  { %v261_v40 = vrot.slane %v260_v39, 1 }
 0x1d8   :  { %v262_v42 = vadd.f32 %v261_v40, %v260_v39 }
 0x1da   :  { %v273_v43 = vsel %vm210_vm12, %v262_v42, %v255_v41 }
 0x1db   :  { %393 = vmatmul.msk.f32.vlgmr.msra.gmra.mxu2 %vm90_vm0, %v273_v43 }
 0x25e   :  { %v293_v46 = vpop.f32.mrf.mxu2 }
 0x25f   :  { %v294_v47 = vadd.f32 %v408_v45, %v293_v46 }
 0x261   :  { %394 = vmatmul.msk.f32.vlgmr.msra.gmra.mxu3 %vm90_vm0, %v294_v47 }
 0x2e4   :  { %v324_v50 = vpop.f32.mrf.mxu3 }
 0x2e5   :  { %v325_v51 = vadd.f32 %v409_v49, %v324_v50 }
 0x2e7   :  { %v395_v52 = vmul.f32 -1.442695, %v325_v51 }
 0x2e9   :  { %418 = vpow2.f32 %v395_v52 }
 0x2ef   :  { %v419_v53 = vpop.eup %418 }
 0x2f0   :  { %v330_v54 = vadd.f32 1.0, %v419_v53 }
 0x2f2   :  { %420 = vrcp.f32 %v330_v54  ;;  %v342_v58 = vand.u32 2147483648, %v330_v54  ;;  %v340_v60 = vand.u32 2147483647, %v330_v54  ;;  %vm336_vm15 = vweird.f32 %v330_v54 }
 0x2f4   :  { %v343_v62 = vor.u32 1.1754944e-38, %v342_v58  ;;  %vm341_vm1 = vcmp.eq.f32.partialorder %v340_v60, 8.507059e+37 }
 0x2f8   :  { %v421_v55 = vpop.eup %420 }
 0x2f9   :  { %v332_v56 = vmul.f32 %v421_v55, %v330_v54  ;;  %vm337_vm14 = vweird.f32 %v421_v55 }
 0x2fa   :  { %vm338_vm0 = vmor %vm336_vm15, %vm337_vm14 }
 0x2fb   :  { %v333_v57 = vsub.f32 1.0, %v332_v56 }
 0x2fd   :  { %v334_v59 = vmul.f32 %v421_v55, %v333_v57 }
 0x2ff   :  { %v335_v61 = vadd.f32 %v421_v55, %v334_v59 }
 0x301   :  { %v339_v63 = vsel %vm338_vm0, %v421_v55, %v335_v61 }
 0x302   :  { %v344_v0 = vsel %vm341_vm1, %v343_v62, %v339_v63 }
 0x303   :  { %348 = vperm.xlu2 %405, %v344_v0  }
 0x35d   :  { %v349_v1 = vpop.permute.xlu2 %348 }
 0x35e   :  { %v351_v2 = vmul.f32 %v349_v1, %v294_v47 }
 0x360   :  { %353 = vst.msk [vmem:[#allocation9] sm:$0x3] %vm352_vm2, %v351_v2 }
 0x361   :  { %364 = dma.vmem_to_hbm [thread:$0]  %s360_s6, 32, %s362_s0, [#allocation5]  }
 0x362   :  { %546 = dma.done.wait [#allocation5], 32  }
 0x363   :  { %547 = vsyncadd [#allocation5], 4294967264 }
 0x364   :  { %548 = dma.done.wait [#allocation11], 32  }
 0x365   :  { %549 = vsyncadd [#allocation11], 4294967264 }
 0x366   :  { %384 = vsyncpa [#allocation4], 1 }
 0x367   :  { %385 = vsyncpa [#allocation7], 1 }
 0x368   :  { %386 = vsyncpa [#allocation5], 1 }
 0x369   :  { %387 = vsyncpa [#allocation11], 1 }

</bundles_post_ra>
